<compile_context>
chip_gen: v7x
topology: tpu7x:2x2x1
jax: 0.10.0
libtpu: 0.0.40
codegen_flags: <defaults>
</compile_context>

<pallas_src>
import functools

import jax
import jax.numpy as jnp
from jax.experimental import pallas as pl
from jax.experimental.pallas import tpu as pltpu


def se_block_kernel(x_ref, w1_ref, b1_ref, w2_ref, b2_ref, o_ref, acc_ref, *, inv_l):
    l = pl.program_id(1)

    @pl.when(l == 0)
    def _():
        acc_ref[...] = jnp.zeros_like(acc_ref)

    # Partial sum over this L tile; C stays on the lane axis.  f32 accumulation
    # without a full-tile f32 copy of x.
    acc_ref[...] += jnp.sum(x_ref[...], axis=1, dtype=jnp.float32)

    @pl.when(l == pl.num_programs(1) - 1)
    def _():
        s = acc_ref[...] * inv_l                                        # (TB, C)
        h = jnp.dot(s, w1_ref[...], preferred_element_type=jnp.float32)
        h = jnp.maximum(h + b1_ref[...], 0.0)                           # ReLU
        e = jnp.dot(h, w2_ref[...], preferred_element_type=jnp.float32)
        e = jax.nn.sigmoid(e + b2_ref[...])                             # (TB, C)
        o_ref[...] = e.astype(o_ref.dtype)


def _pick_batch_tile(B, max_tb=64):
    """Largest power-of-two multiple-of-8 divisor of B (<= max_tb), else B."""
    if B % 8 != 0:
        return B
    tb = 8
    while tb * 2 <= min(B, max_tb) and B % (tb * 2) == 0:
        tb *= 2
    return tb


def _pick_l_tile(L, row_bytes, target_bytes=4 << 20):
    """Largest multiple-of-8 divisor of L whose (TB, TL, C) tile fits budget."""
    if L % 8 != 0:
        return L  # fall back to full extent (last-two-dims (8,128) rule)
    best = 8
    for tl in range(8, L + 1, 8):
        if L % tl == 0 and tl * row_bytes <= target_bytes:
            best = tl
    return best


def se_block_1d(x, w1, b1, w2, b2, *, b_tile=None, l_tile=None):
    """SEBlock1d forward.

    x : (B, C, L)   activation (PyTorch NCL layout)
    w1: (C, H)      first Linear weight, stored (in, out)
    b1: (H,)
    w2: (H, C)      second Linear weight, stored (in, out)
    b2: (C,)

    Returns (B, C, 1) excitation weights (matching SEBlock1d.forward).
    """
    B, C, L = x.shape
    H = w1.shape[1]
    itemsize = jnp.dtype(x.dtype).itemsize

    # Channels-last layout for the kernel: C on the 128-lane axis.
    # TODO(synk): in a fused model feed (B, L, C) directly and drop this transpose.
    x_t = jnp.transpose(x, (0, 2, 1))  # (B, L, C)

    tb = b_tile if b_tile is not None else _pick_batch_tile(B)
    tl = l_tile if l_tile is not None else _pick_l_tile(L, tb * C * itemsize)
    assert B % tb == 0 and L % tl == 0

    # Biases as (1, H) / (1, C) rows so they broadcast cleanly on TPU.
    b1_2d = b1.reshape(1, H)
    b2_2d = b2.reshape(1, C)

    grid = (B // tb, L // tl)

    cost = pl.CostEstimate(
        flops=int(4 * B * C * H + B * C * L),
        transcendentals=int(B * C),
        bytes_accessed=int(
            (x.size + w1.size + b1.size + w2.size + b2.size + B * C) * itemsize
        ),
    )

    kernel = functools.partial(se_block_kernel, inv_l=float(1.0 / L))

    out = pl.pallas_call(
        kernel,
        out_shape=jax.ShapeDtypeStruct((B, C), x.dtype),
        grid_spec=pltpu.PrefetchScalarGridSpec(
            num_scalar_prefetch=0,
            grid=grid,
            in_specs=[
                # x: pipelined over (batch-tile, L-tile).
                pl.BlockSpec((tb, tl, C), lambda b, l: (b, l, 0)),
                # Weights/biases: constant index_map -> resident across the grid.
                pl.BlockSpec((C, H), lambda b, l: (0, 0)),
                pl.BlockSpec((1, H), lambda b, l: (0, 0)),
                pl.BlockSpec((H, C), lambda b, l: (0, 0)),
                pl.BlockSpec((1, C), lambda b, l: (0, 0)),
            ],
            # Same output block across the L (reduction) axis; store gated by
            # pl.when(l == last) inside the kernel.
            out_specs=pl.BlockSpec((tb, C), lambda b, l: (b, 0)),
            scratch_shapes=[pltpu.VMEM((tb, C), jnp.float32)],
        ),
        compiler_params=pltpu.CompilerParams(
            dimension_semantics=("parallel", "arbitrary"),
        ),
        cost_estimate=cost,
    )(x_t, w1, b1_2d, w2, b2_2d)

    return out.reshape(B, C, 1)


def se_block_ref(x, w1, b1, w2, b2):
    """Pure-JAX reference matching the PyTorch module."""
    s = jnp.mean(x.astype(jnp.float32), axis=-1)  # (B, C)
    h = jnp.maximum(s @ w1 + b1, 0.0)
    e = jax.nn.sigmoid(h @ w2 + b2)
    return e.astype(x.dtype).reshape(x.shape[0], x.shape[1], 1)


if __name__ == "__main__":
    B, C, L, r = 2, 4, 16, 4
    H = C * r

    key = jax.random.PRNGKey(0)
    kx, k1, k2, k3, k4 = jax.random.split(key, 5)

    x = jax.random.normal(kx, (B, C, L), dtype=jnp.float32)
    # PyTorch Linear weight is (out, in); we store the transposed (in, out)
    # layout for direct matmul.
    w1 = jax.random.normal(k1, (C, H), dtype=jnp.float32) * 0.1
    b1 = jax.random.normal(k2, (H,), dtype=jnp.float32) * 0.1
    w2 = jax.random.normal(k3, (H, C), dtype=jnp.float32) * 0.1
    b2 = jax.random.normal(k4, (C,), dtype=jnp.float32) * 0.1

    ref = se_block_ref(x, w1, b1, w2, b2)

    # Default tiling (single L step at this tiny size).
    out = se_block_1d(x, w1, b1, w2, b2)
    jax.block_until_ready(out)
    assert out.shape == (B, C, 1)
    assert jnp.allclose(out, ref, atol=1e-5, rtol=1e-5)

    # Force multiple L tiles to exercise the pipelined accumulator path.
    out2 = se_block_1d(x, w1, b1, w2, b2, l_tile=8)
    jax.block_until_ready(out2)
    assert jnp.allclose(out2, ref, atol=1e-5, rtol=1e-5)

    print("KERNEL_OK")
</pallas_src>

<mosaic_0001>
module attributes {stable_mosaic.version = 11 : i64} {
  func.func @se_block_kernel(%arg0: i32, %arg1: i32, %arg2: memref<2x16x4xf32, #tpu.memory_space<vmem>>, %arg3: memref<4x16xf32, #tpu.memory_space<vmem>>, %arg4: memref<1x16xf32, #tpu.memory_space<vmem>>, %arg5: memref<16x4xf32, #tpu.memory_space<vmem>>, %arg6: memref<1x4xf32, #tpu.memory_space<vmem>>, %arg7: memref<2x4xf32, #tpu.memory_space<vmem>>, %arg8: memref<2x4xf32, #tpu.memory_space<vmem>>) attributes {dimension_semantics = [#tpu.dimension_semantics<parallel>, #tpu.dimension_semantics<arbitrary>], iteration_bounds = array<i64: 1, 1>, scalar_prefetch = 0 : i64, scratch_operands = 1 : i64, tpu.core_type = #tpu.core_type<tc>, window_params = [{transform_indices = @transform_0, window_bounds = array<i64: 2, 16, 4>}, {pipeline_mode = #tpu.pipeline_mode<synchronous>, transform_indices = @transform_1, window_bounds = array<i64: 4, 16>}, {pipeline_mode = #tpu.pipeline_mode<synchronous>, transform_indices = @transform_2, window_bounds = array<i64: 1, 16>}, {pipeline_mode = #tpu.pipeline_mode<synchronous>, transform_indices = @transform_3, window_bounds = array<i64: 16, 4>}, {pipeline_mode = #tpu.pipeline_mode<synchronous>, transform_indices = @transform_4, window_bounds = array<i64: 1, 4>}, {transform_indices = @transform_5, window_bounds = array<i64: 2, 4>}]} {
    %c0_i32 = arith.constant 0 : i32
    %0 = arith.cmpi eq, %arg1, %c0_i32 : i32
    %1 = arith.extui %0 : i1 to i32
    %c0_i32_0 = arith.constant 0 : i32
    %2 = arith.cmpi ne, %1, %c0_i32_0 : i32
    scf.if %2 {
      %cst_9 = arith.constant 0.000000e+00 : f32
      %11 = vector.broadcast %cst_9 : f32 to vector<2x4xf32>
      %c0_10 = arith.constant 0 : index
      %c0_11 = arith.constant 0 : index
      %12 = vector.load %arg8[%c0_10, %c0_11] : memref<2x4xf32, #tpu.memory_space<vmem>>, vector<2x4xf32>
      tpu.vector_store %arg8[%c0_10, %c0_11], %11 {strides = array<i32>} : memref<2x4xf32, #tpu.memory_space<vmem>>, vector<2x4xf32>,
    } else {
    }
    %c0 = arith.constant 0 : index
    %c0_1 = arith.constant 0 : index
    %3 = vector.load %arg8[%c0, %c0_1] : memref<2x4xf32, #tpu.memory_space<vmem>>, vector<2x4xf32>
    %c0_2 = arith.constant 0 : index
    %c0_3 = arith.constant 0 : index
    %c0_4 = arith.constant 0 : index
    %4 = vector.load %arg2[%c0_2, %c0_3, %c0_4] : memref<2x16x4xf32, #tpu.memory_space<vmem>>, vector<2x16x4xf32>
    %cst = arith.constant dense<0.000000e+00> : vector<2x4xf32>
    %5 = vector.multi_reduction <add>, %4, %cst [1] : vector<2x16x4xf32> to vector<2x4xf32>
    %6 = arith.addf %3, %5 : vector<2x4xf32>
    %c0_5 = arith.constant 0 : index
    %c0_6 = arith.constant 0 : index
    %7 = vector.load %arg8[%c0_5, %c0_6] : memref<2x4xf32, #tpu.memory_space<vmem>>, vector<2x4xf32>
    tpu.vector_store %arg8[%c0_5, %c0_6], %6 {strides = array<i32>} : memref<2x4xf32, #tpu.memory_space<vmem>>, vector<2x4xf32>,
    %c0_i32_7 = arith.constant 0 : i32
    %8 = arith.cmpi eq, %arg1, %c0_i32_7 : i32
    %9 = arith.extui %8 : i1 to i32
    %c0_i32_8 = arith.constant 0 : i32
    %10 = arith.cmpi ne, %9, %c0_i32_8 : i32
    scf.if %10 {
      %c0_9 = arith.constant 0 : index
      %c0_10 = arith.constant 0 : index
      %11 = vector.load %arg8[%c0_9, %c0_10] : memref<2x4xf32, #tpu.memory_space<vmem>>, vector<2x4xf32>
      %cst_11 = arith.constant 6.250000e-02 : f32
      %12 = vector.broadcast %cst_11 : f32 to vector<2x4xf32>
      %13 = arith.mulf %11, %12 : vector<2x4xf32>
      %c0_12 = arith.constant 0 : index
      %c0_13 = arith.constant 0 : index
      %14 = vector.load %arg3[%c0_12, %c0_13] : memref<4x16xf32, #tpu.memory_space<vmem>>, vector<4x16xf32>
      %cst_14 = arith.constant dense<0.000000e+00> : vector<2x16xf32>
      %15 = tpu.matmul %13, %14, %cst_14 {dimension_numbers = #tpu.dot_dimension_numbers<[1], [0], [0], [1], [0, 0, 1, 1], [], []>} : vector<2x4xf32>, vector<4x16xf32>, vector<2x16xf32> -> vector<2x16xf32>
      %c0_15 = arith.constant 0 : index
      %c0_16 = arith.constant 0 : index
      %16 = vector.load %arg4[%c0_15, %c0_16] : memref<1x16xf32, #tpu.memory_space<vmem>>, vector<1x16xf32>
      %17 = vector.broadcast %16 : vector<1x16xf32> to vector<2x16xf32>
      %18 = arith.addf %15, %17 : vector<2x16xf32>
      %cst_17 = arith.constant 0.000000e+00 : f32
      %19 = vector.broadcast %cst_17 : f32 to vector<2x16xf32>
      %20 = arith.maximumf %18, %19 : vector<2x16xf32>
      %c0_18 = arith.constant 0 : index
      %c0_19 = arith.constant 0 : index
      %21 = vector.load %arg5[%c0_18, %c0_19] : memref<16x4xf32, #tpu.memory_space<vmem>>, vector<16x4xf32>
      %cst_20 = arith.constant dense<0.000000e+00> : vector<2x4xf32>
      %22 = tpu.matmul %20, %21, %cst_20 {dimension_numbers = #tpu.dot_dimension_numbers<[1], [0], [0], [1], [0, 0, 1, 1], [], []>} : vector<2x16xf32>, vector<16x4xf32>, vector<2x4xf32> -> vector<2x4xf32>
      %c0_21 = arith.constant 0 : index
      %c0_22 = arith.constant 0 : index
      %23 = vector.load %arg6[%c0_21, %c0_22] : memref<1x4xf32, #tpu.memory_space<vmem>>, vector<1x4xf32>
      %24 = vector.broadcast %23 : vector<1x4xf32> to vector<2x4xf32>
      %25 = arith.addf %22, %24 : vector<2x4xf32>
      %26 = arith.negf %25 : vector<2x4xf32>
      %27 = math.exp %26 : vector<2x4xf32>
      %cst_23 = arith.constant 1.000000e+00 : f32
      %28 = vector.broadcast %cst_23 : f32 to vector<2x4xf32>
      %29 = arith.addf %28, %27 : vector<2x4xf32>
      %30 = arith.divf %28, %29 : vector<2x4xf32>
      %c0_24 = arith.constant 0 : index
      %c0_25 = arith.constant 0 : index
      %31 = vector.load %arg7[%c0_24, %c0_25] : memref<2x4xf32, #tpu.memory_space<vmem>>, vector<2x4xf32>
      tpu.vector_store %arg7[%c0_24, %c0_25], %30 {strides = array<i32>} : memref<2x4xf32, #tpu.memory_space<vmem>>, vector<2x4xf32>,
    } else {
    }
    return
  }
  func.func @transform_0(%arg0: i32, %arg1: i32) -> (i32, i32, i32) {
    %c0_i32 = arith.constant 0 : i32
    %c0_i32_0 = arith.constant 0 : i32
    return %arg0, %arg1, %c0_i32 : i32, i32, i32
  }
  func.func @transform_1(%arg0: i32, %arg1: i32) -> (i32, i32) {
    %c0_i32 = arith.constant 0 : i32
    %c0_i32_0 = arith.constant 0 : i32
    %c0_i32_1 = arith.constant 0 : i32
    return %c0_i32, %c0_i32_0 : i32, i32
  }
  func.func @transform_2(%arg0: i32, %arg1: i32) -> (i32, i32) {
    %c0_i32 = arith.constant 0 : i32
    %c0_i32_0 = arith.constant 0 : i32
    %c0_i32_1 = arith.constant 0 : i32
    return %c0_i32, %c0_i32_0 : i32, i32
  }
  func.func @transform_3(%arg0: i32, %arg1: i32) -> (i32, i32) {
    %c0_i32 = arith.constant 0 : i32
    %c0_i32_0 = arith.constant 0 : i32
    %c0_i32_1 = arith.constant 0 : i32
    return %c0_i32, %c0_i32_0 : i32, i32
  }
  func.func @transform_4(%arg0: i32, %arg1: i32) -> (i32, i32) {
    %c0_i32 = arith.constant 0 : i32
    %c0_i32_0 = arith.constant 0 : i32
    %c0_i32_1 = arith.constant 0 : i32
    return %c0_i32, %c0_i32_0 : i32, i32
  }
  func.func @transform_5(%arg0: i32, %arg1: i32) -> (i32, i32) {
    %c0_i32 = arith.constant 0 : i32
    %c0_i32_0 = arith.constant 0 : i32
    return %arg0, %c0_i32 : i32, i32
  }
}

</mosaic_0001>

<bundles_post_ra>
// kernel: tpu_custom_call.1
= control target key start
LH: loop header
LB: loop body
LE: loop exit
PB: predicated region body
PF: predicated region fallthrough
CT: control target
= control target key end

     0   :  { %vm25_vm0 = vcmask 25600   ;;  %vm75_vm1 = vcmask 1043456   ;;  %v312_v1 = vmov 0.0   ;;  %vm313_vm2 = vmmov 0   ;;  %s393_s0 = inlined_call_operand.vmem [shape: f32[2,16,4], index: 0, kind: input, shape index: {}]   ;;  %s394_s1 = inlined_call_operand.vmem [shape: f32[4,16], index: 1, kind: input, shape index: {}]   ;;  %s395_s2 = inlined_call_operand.vmem [shape: f32[1,16], index: 2, kind: input, shape index: {}]   ;;  %s396_s3 = inlined_call_operand.vmem [shape: f32[16,4], index: 3, kind: input, shape index: {}]   ;;  %s397_s4 = inlined_call_operand.vmem [shape: f32[1,4], index: 4, kind: input, shape index: {}]   ;;  %s398_s5 = inlined_call_operand.hbm [shape: f32[2,4], index: 5, kind: output, shape index: {}]  }
   0x1   :  { %v64_v0 = vld [vmem:[%s394_s1] sm:$0xf]  ;;  %26 = vst.msk [vmem:[#allocation2] sm:$0x3] %vm25_vm0, %v312_v1  ;;  %265 = vmatprep.subr.mxu0 %v312_v1  ;;  %267 = vmatprep.mubr.msk.f32.mxu0 %vm313_vm2, %v312_v1  ;;  %v29_v3 = vld [vmem:[%s393_s0 + $0x8] sm:$0xff]  ;;  %v30_v4 = vld [vmem:[%s393_s0 + $0x10] sm:$0xff] }
   0x2   :  { %v28_v2 = vld [vmem:[%s393_s0] sm:$0xff]  ;;  %vm32_vm3 = vcmask 31744   ;;  %266 = vmatpush3.msk.msra.mxu0 %vm75_vm1, %v64_v0  ;;  %v31_v5 = vld [vmem:[%s393_s0 + $0x18] sm:$0xff]  ;;  %274 = vmatprep.mubr.msk.f32.mxu1 %vm313_vm2, %v312_v1 }
   0x3   :  { %v33_v6 = vsel %vm32_vm3, %v28_v2, 0.0  ;;  %v34_v7 = vsel %vm32_vm3, %v29_v3, 0.0  ;;  %v42_v8 = vsel %vm32_vm3, %v30_v4, 0.0  ;;  %v43_v10 = vsel %vm32_vm3, %v31_v5, 0.0 }
   0x4   :  { %v35_v9 = vadd.f32 %v34_v7, %v33_v6 }
   0x5   :  { %10 = vsyncpa [#allocation4], 0  ;;  %v44_v11 = vadd.f32 %v43_v10, %v42_v8  ;;  %vm53_vm4 = vcmask 1041409   ;;  %v150_v29 = vld [vmem:[%s396_s3] sm:$0xff]  ;;  %v151_v30 = vld [vmem:[%s396_s3 + $0x8] sm:$0xff]  ;;  %v314_v32 = vmov 0.0|0.0  }
   0x6   :  { %v36_v12 = vrot.slane %v35_v9, 4  ;;  %v278_v31 = vpack.c.bf16 %v151_v30, %v150_v29  ;;  %277 = vmatprep.subr.bf16.mxu1 %v314_v32  ;;  %v254_v33 = vld [vmem:[%s395_s2] ss:$0 sm:$0xff]  ;;  %vm159_vm5 = vcmask 130048   ;;  %s315_s3 = smov [#allocation3]  }
   0x7   :  { %v45_v13 = vrot.slane %v44_v11, 4  ;;  %v257_v38 = vld [vmem:[%s397_s4] ss:$0 sm:$0xff]  ;;  %s246_s2 = sshll.u32 %s315_s3, 4  ;;  %s247_s2 = int_to_ptr.vmem [resolvable:$true] %s246_s2 }
   0x8   :  { %v37_v14 = vadd.f32 %v36_v12, %v35_v9  ;;  %v27_v23 = vld [vmem:[#allocation2] sm:$0x3]  ;;  %279 = vmatpush3.bf16.msra.mxu1 %v278_v31  ;;  %s288_s9 = scalar_lea.vmem %s247_s2, 32  ;;  %p293_p1 = scmp.lt.s32.totalorder %s247_s2, %s247_s2 }
   0x9   :  { %v46_v15 = vadd.f32 %v45_v13, %v44_v11  ;;  %p289_p0 = scmp.ne.s32.totalorder %s247_s2, %s288_s9  ;;  %p294_p2 = scmp.lt.s32.totalorder %s288_s9, %s288_s9 }
   0xa   :  { %v38_v16 = vrot.slane %v37_v14, 2 }
   0xb   :  { %v47_v17 = vrot.slane %v46_v15, 2  ;;  %p295_p3 = por %p294_p2, %p293_p1 }
   0xc   :  { %v39_v18 = vadd.f32 %v38_v16, %v37_v14 }
   0xd   :  { %v48_v19 = vadd.f32 %v47_v17, %v46_v15  ;;  %p296_p4 = pnand %p295_p3, %p289_p0 }
   0xe   :  { %v40_v20 = vrot.slane %v39_v18, 1 }
   0xf   :  { %v49_v21 = vrot.slane %v48_v19, 1 }
  0x10   :  { %v41_v22 = vadd.f32 %v40_v20, %v39_v18 }
  0x11   :  { %v50_v24 = vadd.f32 %v49_v21, %v48_v19 }
  0x13   :  { %v54_v25 = vsel %vm53_vm4, %v50_v24, %v41_v22 }
  0x14   :  { %v56_v26 = vadd.f32 %v54_v25, %v27_v23 }
  0x16   :  { %58 = vst.msk [vmem:[#allocation2] sm:$0x3] %vm25_vm0, %v56_v26 }
  0x1d   :  { %v62_v27 = vld [vmem:[#allocation2] sm:$0x3] }
  0x1e   :  { %v63_v28 = vmul.f32 0.0625, %v62_v27 }
  0x20   :  { %268 = vmatmul.mubr.msk.f32.vlgmr.msra.gmra.mrb[0].mxu0 %vm32_vm3, %v63_v28 }
  0xf3   :  { %v145_v34 = vpop.f32.mrb[0].mxu0 }
  0xf4   :  { %v146_v35 = vadd.f32 %v254_v33, %v145_v34  ;;  %v269_v36 = vpop.f32.mrb[1].mxu0 }
  0xf6   :  { %v149_v37 = vmax.f32 %v146_v35, 0.0 }
  0xf8   :  { %275 = vmatmul.mubr.msk.f32.vlgmr.msra.gmra.mrb[0].mxu1 %vm159_vm5, %v149_v37 }
 0x1cb   :  { %v229_v39 = vpop.f32.mrb[0].mxu1 }
 0x1cc   :  { %v230_v40 = vadd.f32 %v257_v38, %v229_v39  ;;  %v276_v41 = vpop.f32.mrb[1].mxu1 }
 0x1ce   :  { %v259_v42 = vmul.f32 -1.442695, %v230_v40 }
 0x1d0   :  { %284 = vpow2.f32 %v259_v42 }
 0x1da   :  { %v285_v43 = vpop.eup %284 }
 0x1db   :  { %v236_v44 = vadd.f32 1.0, %v285_v43 }
 0x1dd   :  { %286 = vrcp.f32 %v236_v44 }
 0x1e7   :  { %v287_v45 = vpop.eup %286 }
 0x1e8   :  { %239 = vst.msk [vmem:[#allocation3] sm:$0x3] %vm25_vm0, %v287_v45 }
 0x1e9   :  { %299 = shalt.err (!%p296_p4)
}
 0x1ea   :  { %s300_s11 = scalar_lea.hbm %s398_s5, 32 }
 0x1eb   :  { %p301_p5 = scmp.ne.s32.totalorder %s398_s5, %s300_s11  ;;  %p304_p6 = scmp.lt.u32.totalorder %s300_s11, %s398_s5 }
 0x1ed   :  { %p306_p7 = pnand %p304_p6, %p301_p5 }
 0x1ef   :  { %309 = shalt.err (!%p306_p7)
}
 0x1f0   :  { %249 = dma.vmem_to_hbm [thread:$0]  %s247_s2, 32, %s398_s5, [#allocation4]  }
 0x1f1   :  { %310 = dma.done.wait [#allocation4], 32  }
 0x1f2   :  { %311 = vsyncadd [#allocation4], 4294967264 }
 0x1f3   :  { %253 = vsyncpa [#allocation4], 1 }

</bundles_post_ra>
